<compile_context>
chip_gen: v6e
topology: v6e:2x2x1
jax: 0.10.0
libtpu: 0.0.40
codegen_flags: <defaults>
</compile_context>

<pallas_src>
import jax
import jax.numpy as jnp
from jax import lax
from jax.experimental import pallas as pl
from jax.experimental.pallas import tpu as pltpu

SUB_B = 512        # inner compute sub-slab (lanes); keeps live set ~33 vregs
MAX_TILE_B = 8192  # max lanes per grid step (DMA block); multiple of SUB_B


def policy_net_kernel(xT_ref, w1T_ref, b1_ref, w2T_ref, b2_ref, w3T_ref, b3_ref, o_ref):
    # Weights/biases are tiny; constant index_maps keep them VMEM-resident across the grid.
    w1T = w1T_ref[...]   # [24, 4]
    b1 = b1_ref[...]     # [24, 1]
    w2T = w2T_ref[...]   # [36, 24]
    b2 = b2_ref[...]     # [36, 1]
    w3T = w3T_ref[...]   # [1, 36]
    b3 = b3_ref[...]     # [1, 1]

    n_sub = o_ref.shape[-1] // SUB_B  # static: TILE_B / SUB_B

    def body(j, carry):
        col = pl.multiple_of(j * SUB_B, SUB_B)
        xs = xT_ref[:, pl.ds(col, SUB_B)]                          # [4, SUB_B]
        # Layer 1: [24,4] @ [4,SUB_B] + [24,1] -> relu
        h1 = jnp.dot(w1T, xs, preferred_element_type=jnp.float32)
        h1 = jnp.maximum(h1 + b1, 0.0)
        # Layer 2: [36,24] @ [24,SUB_B] + [36,1] -> relu
        h2 = jnp.dot(w2T, h1, preferred_element_type=jnp.float32)
        h2 = jnp.maximum(h2 + b2, 0.0)
        # Layer 3: [1,36] @ [36,SUB_B] + [1,1] -> sigmoid (EUP tanh form, lane-dense store)
        z = jnp.dot(w3T, h2, preferred_element_type=jnp.float32) + b3
        o_ref[:, pl.ds(col, SUB_B)] = 0.5 * jnp.tanh(0.5 * z) + 0.5
        return carry

    lax.fori_loop(0, n_sub, body, 0, unroll=True)


def _pick_tile(batch):
    """Lanes per grid step: big enough to amortize the ~0.35 us per-step overhead, small
    enough to fit every chip's scoped-VMEM default, and >=2 grid steps when possible so
    v7x megacore gets both TensorCores busy."""
    n_sub = max(1, pl.cdiv(batch, SUB_B))
    if n_sub == 1:
        return SUB_B
    subs_per_tile = min(MAX_TILE_B // SUB_B, pl.cdiv(n_sub, 2))
    return subs_per_tile * SUB_B


def policy_net_forward_xt(xT, params):
    """xT: [4, B] float32, batch on lanes (preferred entry point: no extra HBM pass).

    Returns [1, B] float32 == sigmoid(relu(relu(x@w1+b1)@w2+b2)@w3+b3) transposed.
    """
    _, B = xT.shape
    w1, b1, w2, b2, w3, b3 = (params[k] for k in ("w1", "b1", "w2", "b2", "w3", "b3"))
    w1T, w2T, w3T = w1.T, w2.T, w3.T   # [out, in]   (tiny, negligible copies)
    b1T, b2T, b3T = b1.T, b2.T, b3.T   # [out, 1]

    tile_b = _pick_tile(B)
    grid = (pl.cdiv(B, tile_b),)       # ragged last block handled by Pallas; no zero-pad
    const = lambda a: pl.BlockSpec(a.shape, lambda i: (0, 0))  # VMEM-resident weights

    return pl.pallas_call(
        policy_net_kernel,
        out_shape=jax.ShapeDtypeStruct((1, B), jnp.float32),
        grid=grid,
        in_specs=[
            # x tile: batch on lanes.  If DMA ever shows exposed in a trace, add
            # pipeline_mode=pl.Buffered(3) here (cheap: 32*TILE_B bytes per extra buffer).
            pl.BlockSpec((4, tile_b), lambda i: (0, i)),
            const(w1T), const(b1T),
            const(w2T), const(b2T),
            const(w3T), const(b3T),
        ],
        out_specs=pl.BlockSpec((1, tile_b), lambda i: (0, i)),  # lane-dense output row
        compiler_params=pltpu.CompilerParams(
            dimension_semantics=("parallel",),                  # megacore sharding on v7x
        ),
    )(xT, w1T, b1T, w2T, b2T, w3T, b3T)


def policy_net_forward(x, params):
    """x: [B, 4] (or [4]) float32. Returns [B, 1] (or [1]); same semantics as the torch module."""
    x = jnp.asarray(x, jnp.float32)
    squeeze = x.ndim == 1
    if squeeze:
        x = x[None, :]
    # x.T is the one remaining extra HBM pass; produce xT upstream where possible.
    outT = policy_net_forward_xt(x.T, params)
    out = outT.T                                   # [B, 1]
    return out[0] if squeeze else out


def init_params(key):
    """Deterministic init mirroring nn.Linear default (uniform(-1/sqrt(fan_in), +))."""
    dims = [(4, 24), (24, 36), (36, 1)]
    params = {}
    for i, (fan_in, fan_out) in enumerate(dims, start=1):
        key, kw, kb = jax.random.split(key, 3)
        bound = 1.0 / jnp.sqrt(float(fan_in))
        params[f"w{i}"] = jax.random.uniform(
            kw, (fan_in, fan_out), jnp.float32, -bound, bound
        )
        params[f"b{i}"] = jax.random.uniform(
            kb, (1, fan_out), jnp.float32, -bound, bound
        )
    return params


def reference_forward(x, params):
    h1 = jnp.maximum(x @ params["w1"] + params["b1"], 0.0)
    h2 = jnp.maximum(h1 @ params["w2"] + params["b2"], 0.0)
    return jax.nn.sigmoid(h2 @ params["w3"] + params["b3"])


if __name__ == "__main__":
    key = jax.random.PRNGKey(0)
    kx, kp = jax.random.split(key)
    # Small batch that still exercises: 2 grid steps (megacore path), the inner sub-slab
    # loop, and the ragged last block (1000 % 512 != 0).  Semantics hold for any B.
    B = 1000
    x = jax.random.normal(kx, (B, 4), jnp.float32)
    params = init_params(kp)

    out = jax.block_until_ready(policy_net_forward(x, params))
    ref = reference_forward(x, params)

    assert out.shape == (B, 1)
    assert jnp.allclose(out, ref, atol=1e-4, rtol=1e-4), float(jnp.max(jnp.abs(out - ref)))
    print("KERNEL_OK")
</pallas_src>

<mosaic_0001>
module attributes {stable_mosaic.version = 11 : i64} {
  func.func @policy_net_kernel(%arg0: i32, %arg1: memref<4x512xf32, #tpu.memory_space<vmem>>, %arg2: memref<24x4xf32, #tpu.memory_space<vmem>>, %arg3: memref<24x1xf32, #tpu.memory_space<vmem>>, %arg4: memref<36x24xf32, #tpu.memory_space<vmem>>, %arg5: memref<36x1xf32, #tpu.memory_space<vmem>>, %arg6: memref<1x36xf32, #tpu.memory_space<vmem>>, %arg7: memref<1x1xf32, #tpu.memory_space<vmem>>, %arg8: memref<1x512xf32, #tpu.memory_space<vmem>>) attributes {dimension_semantics = [#tpu.dimension_semantics<parallel>], iteration_bounds = array<i64: 2>, scalar_prefetch = 0 : i64, scratch_operands = 0 : i64, tpu.core_type = #tpu.core_type<tc>, window_params = [{transform_indices = @transform_0, window_bounds = array<i64: 4, 512>}, {pipeline_mode = #tpu.pipeline_mode<synchronous>, transform_indices = @transform_1, window_bounds = array<i64: 24, 4>}, {pipeline_mode = #tpu.pipeline_mode<synchronous>, transform_indices = @transform_2, window_bounds = array<i64: 24, 1>}, {pipeline_mode = #tpu.pipeline_mode<synchronous>, transform_indices = @transform_3, window_bounds = array<i64: 36, 24>}, {pipeline_mode = #tpu.pipeline_mode<synchronous>, transform_indices = @transform_4, window_bounds = array<i64: 36, 1>}, {pipeline_mode = #tpu.pipeline_mode<synchronous>, transform_indices = @transform_5, window_bounds = array<i64: 1, 36>}, {pipeline_mode = #tpu.pipeline_mode<synchronous>, transform_indices = @transform_6, window_bounds = array<i64: 1, 1>}, {transform_indices = @transform_7, window_bounds = array<i64: 1, 512>}]} {
    %c0 = arith.constant 0 : index
    %c0_0 = arith.constant 0 : index
    %0 = vector.load %arg2[%c0, %c0_0] : memref<24x4xf32, #tpu.memory_space<vmem>>, vector<24x4xf32>
    %c0_1 = arith.constant 0 : index
    %c0_2 = arith.constant 0 : index
    %1 = vector.load %arg3[%c0_1, %c0_2] : memref<24x1xf32, #tpu.memory_space<vmem>>, vector<24x1xf32>
    %c0_3 = arith.constant 0 : index
    %c0_4 = arith.constant 0 : index
    %2 = vector.load %arg4[%c0_3, %c0_4] : memref<36x24xf32, #tpu.memory_space<vmem>>, vector<36x24xf32>
    %c0_5 = arith.constant 0 : index
    %c0_6 = arith.constant 0 : index
    %3 = vector.load %arg5[%c0_5, %c0_6] : memref<36x1xf32, #tpu.memory_space<vmem>>, vector<36x1xf32>
    %c0_7 = arith.constant 0 : index
    %c0_8 = arith.constant 0 : index
    %4 = vector.load %arg6[%c0_7, %c0_8] : memref<1x36xf32, #tpu.memory_space<vmem>>, vector<1x36xf32>
    %c0_9 = arith.constant 0 : index
    %c0_10 = arith.constant 0 : index
    %5 = vector.load %arg7[%c0_9, %c0_10] : memref<1x1xf32, #tpu.memory_space<vmem>>, vector<1x1xf32>
    %c0_i32 = arith.constant 0 : i32
    %c512_i32 = arith.constant 512 : i32
    %6 = arith.muli %c0_i32, %c512_i32 : i32
    %7 = tpu.assume_multiple %6, 512 : i32
    %c0_11 = arith.constant 0 : index
    %8 = arith.index_cast %7 : i32 to index
    %9 = vector.load %arg1[%c0_11, %8] : memref<4x512xf32, #tpu.memory_space<vmem>>, vector<4x512xf32>
    %cst = arith.constant dense<0.000000e+00> : vector<24x512xf32>
    %10 = tpu.matmul %0, %9, %cst {dimension_numbers = #tpu.dot_dimension_numbers<[1], [0], [0], [1], [0, 0, 1, 1], [], []>} : vector<24x4xf32>, vector<4x512xf32>, vector<24x512xf32> -> vector<24x512xf32>
    %11 = vector.broadcast %1 : vector<24x1xf32> to vector<24x512xf32>
    %12 = arith.addf %10, %11 : vector<24x512xf32>
    %cst_12 = arith.constant 0.000000e+00 : f32
    %13 = vector.broadcast %cst_12 : f32 to vector<24x512xf32>
    %14 = arith.maximumf %12, %13 : vector<24x512xf32>
    %cst_13 = arith.constant dense<0.000000e+00> : vector<36x512xf32>
    %15 = tpu.matmul %2, %14, %cst_13 {dimension_numbers = #tpu.dot_dimension_numbers<[1], [0], [0], [1], [0, 0, 1, 1], [], []>} : vector<36x24xf32>, vector<24x512xf32>, vector<36x512xf32> -> vector<36x512xf32>
    %16 = vector.broadcast %3 : vector<36x1xf32> to vector<36x512xf32>
    %17 = arith.addf %15, %16 : vector<36x512xf32>
    %cst_14 = arith.constant 0.000000e+00 : f32
    %18 = vector.broadcast %cst_14 : f32 to vector<36x512xf32>
    %19 = arith.maximumf %17, %18 : vector<36x512xf32>
    %cst_15 = arith.constant dense<0.000000e+00> : vector<1x512xf32>
    %20 = tpu.matmul %4, %19, %cst_15 {dimension_numbers = #tpu.dot_dimension_numbers<[1], [0], [0], [1], [0, 0, 1, 1], [], []>} : vector<1x36xf32>, vector<36x512xf32>, vector<1x512xf32> -> vector<1x512xf32>
    %21 = vector.broadcast %5 : vector<1x1xf32> to vector<1x512xf32>
    %22 = arith.addf %20, %21 : vector<1x512xf32>
    %cst_16 = arith.constant 5.000000e-01 : f32
    %23 = vector.broadcast %cst_16 : f32 to vector<1x512xf32>
    %24 = arith.mulf %23, %22 : vector<1x512xf32>
    %25 = math.tanh %24 : vector<1x512xf32>
    %cst_17 = arith.constant 5.000000e-01 : f32
    %26 = vector.broadcast %cst_17 : f32 to vector<1x512xf32>
    %27 = arith.mulf %26, %25 : vector<1x512xf32>
    %cst_18 = arith.constant 5.000000e-01 : f32
    %28 = vector.broadcast %cst_18 : f32 to vector<1x512xf32>
    %29 = arith.addf %27, %28 : vector<1x512xf32>
    %c0_19 = arith.constant 0 : index
    %30 = arith.index_cast %7 : i32 to index
    %31 = vector.load %arg8[%c0_19, %30] : memref<1x512xf32, #tpu.memory_space<vmem>>, vector<1x512xf32>
    tpu.vector_store %arg8[%c0_19, %30], %29 {strides = array<i32>} : memref<1x512xf32, #tpu.memory_space<vmem>>, vector<1x512xf32>,
    %c1_i32 = arith.constant 1 : i32
    return
  }
  func.func @transform_0(%arg0: i32) -> (i32, i32) {
    %c0_i32 = arith.constant 0 : i32
    %c0_i32_0 = arith.constant 0 : i32
    return %c0_i32, %arg0 : i32, i32
  }
  func.func @transform_1(%arg0: i32) -> (i32, i32) {
    %c0_i32 = arith.constant 0 : i32
    %c0_i32_0 = arith.constant 0 : i32
    %c0_i32_1 = arith.constant 0 : i32
    return %c0_i32, %c0_i32_0 : i32, i32
  }
  func.func @transform_2(%arg0: i32) -> (i32, i32) {
    %c0_i32 = arith.constant 0 : i32
    %c0_i32_0 = arith.constant 0 : i32
    %c0_i32_1 = arith.constant 0 : i32
    return %c0_i32, %c0_i32_0 : i32, i32
  }
  func.func @transform_3(%arg0: i32) -> (i32, i32) {
    %c0_i32 = arith.constant 0 : i32
    %c0_i32_0 = arith.constant 0 : i32
    %c0_i32_1 = arith.constant 0 : i32
    return %c0_i32, %c0_i32_0 : i32, i32
  }
  func.func @transform_4(%arg0: i32) -> (i32, i32) {
    %c0_i32 = arith.constant 0 : i32
    %c0_i32_0 = arith.constant 0 : i32
    %c0_i32_1 = arith.constant 0 : i32
    return %c0_i32, %c0_i32_0 : i32, i32
  }
  func.func @transform_5(%arg0: i32) -> (i32, i32) {
    %c0_i32 = arith.constant 0 : i32
    %c0_i32_0 = arith.constant 0 : i32
    %c0_i32_1 = arith.constant 0 : i32
    return %c0_i32, %c0_i32_0 : i32, i32
  }
  func.func @transform_6(%arg0: i32) -> (i32, i32) {
    %c0_i32 = arith.constant 0 : i32
    %c0_i32_0 = arith.constant 0 : i32
    %c0_i32_1 = arith.constant 0 : i32
    return %c0_i32, %c0_i32_0 : i32, i32
  }
  func.func @transform_7(%arg0: i32) -> (i32, i32) {
    %c0_i32 = arith.constant 0 : i32
    %c0_i32_0 = arith.constant 0 : i32
    return %c0_i32, %arg0 : i32, i32
  }
}

</mosaic_0001>

<bundles_post_ra>
// kernel: tpu_custom_call.1
= control target key start
LH: loop header
LB: loop body
LE: loop exit
PB: predicated region body
PF: predicated region fallthrough
CT: control target
= control target key end

     0   :  { %s1441_s0 = inlined_call_operand.vmem [shape: f32[4,1000], index: 0, kind: input, shape index: {}]   ;;  %s1442_s1 = inlined_call_operand.vmem [shape: f32[24,4], index: 1, kind: input, shape index: {}]   ;;  %s1443_s2 = inlined_call_operand.vmem [shape: f32[24,1], index: 2, kind: input, shape index: {}]   ;;  %s1444_s3 = inlined_call_operand.vmem [shape: f32[36,24], index: 3, kind: input, shape index: {}]   ;;  %s1445_s4 = inlined_call_operand.vmem [shape: f32[36,1], index: 4, kind: input, shape index: {}]   ;;  %s1446_s5 = inlined_call_operand.vmem [shape: f32[1,36], index: 5, kind: input, shape index: {}]   ;;  %s1447_s6 = inlined_call_operand.<no memory space> [shape: f32[1,1], index: 6, kind: input, shape index: {}]   ;;  %s1448_s7 = inlined_call_operand.hbm [shape: f32[1,1000], index: 7, kind: output, shape index: {}]  }
   0x1   :  { %v12_v0 = vstv %s1447_s6 }
   0x2   :  { %13 = vst [vmem:[#allocation2] sm:$0x1] %v12_v0 }
   0x3   :  { %14 = vsyncpa [#allocation4], 0 }
   0x4   :  { %16 = vsyncpa [#allocation4 + $0x1], 0  ;;  %s1262_s26 = smov 0   ;;  %s1264_s27 = smov 0  }
   0x5   :  { %s1266_s28 = smov 0   ;;  %s1268_s29 = smov 0  }
   0x6 LB: > { %s1283_s6 = sadd.s32 4294967295, %s1213_s29   ;;  %s1060_s30 = sadd.s32 4294967294, %s1213_s29   ;;  %s1213_s29 = sphi %s1268_s29, %s1454_s29   ;;  %s1209_s28 = sphi %s1266_s28, %s1453_s28   ;;  %s1205_s27 = sphi %s1264_s27, %s1452_s27   ;;  %s1201_s26 = sphi %s1262_s26, %s1451_s26  }
   0x7   : > { %s1287_s8 = sadd.s32 1, %s1213_s29   ;;  %s181_s9 = sadd.s32 1, %s1209_s28 }
   0x8   : > { %s178_s10 = ssub.s32 %s1213_s29, %s1287_s8  ;;  %p191_p0 = scmp.ne.s32.totalorder %s1209_s28, %s1205_s27 }
   0x9   : > { %p179_p1 = scmp.eq.s32.totalorder %s178_s10, 0  ;;  %p192_p2 = scmp.eq.s32.totalorder %s1283_s6, 1 }
   0xa   : > { %p197_p3 = scmp.ne.s32.totalorder %s1205_s27, %s1201_s26  ;;  %p198_p4 = scmp.eq.s32.totalorder %s1060_s30, 1 }
   0xb   : > { %s1298_s11 = scalar_select %p179_p1, %s1209_s28, %s181_s9  }
   0xc   : > { %p1300_p5 = por %p192_p2, %p191_p0  ;;  %p1304_p6 = por %p198_p4, %p197_p3 }
   0xd   : > { %p1063_p7 = scmp.ge.s32.totalorder %s1213_s29, 1  ;;  %p243_p8 = scmp.lt.s32.totalorder %s1213_s29, 3 }
   0xf   : > { %p244_p9 = pnand %p1063_p7, %p243_p8 }
  0x10   : > { %s1065_s14 = sshll.u32 (!%p244_p9), %s1283_s6, 2  ;;  %s1098_s25 = sshll.u32 (!%p244_p9), %s1283_s6, 6 }
  0x11   : > { %247 = sbr.rel (%p244_p9) target bundleno = 708 (0x2c4), region = 48  ;;  %p276_p10 = scmp.lt.s32.totalorder (!%p244_p9), %s1065_s14, 7 }
  0x12   : > { %s999_s15 = scalar_lea.hbm (!%p244_p9), %s1448_s7, %s1098_s25  ;;  %s1218_s18 = smov (!%p244_p9), [#allocation3]  }
  0x13   : > { %s1157_s19 = sshll.u32 (!%p244_p9), %s1218_s18, 4  ;;  %s1158_s19 = int_to_ptr.vmem [resolvable:$false] %s1157_s19 }
  0x14   : > { %s1159_s6 = scalar_lea.vmem (!%p244_p9), %s1158_s19, 128 }
  0x16   : > { %v1215_v1 = vmov 0.0   ;;  %v287_v2 = vld [vmem:[%s1443_s2 + $0x10] sm:$0xff]  ;;  %v1216_v3 = vmov 0   ;;  %v285_v4 = vld [vmem:[%s1443_s2] sm:$0xff]  ;;  %s1456_s14 = smov (!%p276_p10, %s1065_s14), 7  ;;  %v286_v5 = vld [vmem:[%s1443_s2 + $0x8] sm:$0xff] }
  0x17   : > { %404 = vmatprep.mubr.f32.mxu0 %v1215_v1  ;;  %487 = vmatprep.mubr.f32.mxu1 %v1215_v1  ;;  %v297_v6 = vld [vmem:[%s1445_s4 + $0x20] sm:$0xf]  ;;  %s1066_s23 = sshll.u32 %s1456_s14, 2  ;;  %vm331_vm0 = vcmask 1043456   ;;  %vm321_vm1 = vcmask 31744   ;;  %v296_v12 = vld [vmem:[%s1445_s4 + $0x18] sm:$0xff] }
  0x18   : > { %1141 = vset.pattern.permute.xlu0 %v1216_v3  ;;  %1142 = vset.pattern.permute.xlu1 %v1216_v3  ;;  %s279_s30 = scalar_lea.vmem %s1441_s0, %s1066_s23  ;;  %v282_v11 = vld [vmem:[%s1442_s1] sm:$0xff]  ;;  %v295_v13 = vld [vmem:[%s1445_s4 + $0x10] sm:$0xff]  ;;  %v283_v14 = vld [vmem:[%s1442_s1 + $0x8] sm:$0xff]  ;;  %vm543_vm2 = vcmask 195584   ;;  %vm778_vm3 = vcmask 293888   ;;  %s272_s23 = sand.u32 1, %s1205_s27  }
  0x19   : > { %314 = vperm.xlu0 %1141, %v287_v2   ;;  %304 = vperm.xlu1 %1142, %v285_v4   ;;  %v300_v7 = vld [vmem:[%s279_s30] sm:$0xff]  ;;  %v301_v8 = vld [vmem:[%s279_s30 + $0x8] sm:$0xff]  ;;  %v284_v17 = vld [vmem:[%s1442_s1 + $0x10] sm:$0xff]  ;;  %s1064_s24 = sshll.u32 %s272_s23, 2  ;;  %s987_s16 = scalar_lea.sflag [#allocation4], %s272_s23 }
  0x1a   : > { %v319_v9 = vcombine.high %v300_v7, %v300_v7  ;;  %v320_v10 = vcombine.high %v301_v8, %v301_v8  ;;  %v294_v15 = vld [vmem:[%s1445_s4 + $0x8] sm:$0xff]  ;;  %v293_v16 = vld [vmem:[%s1445_s4] sm:$0xff]  ;;  %v290_v60 = vld [vmem:[%s1444_s3 + $0x10] sm:$0xff]  ;;  %s274_s30 = scalar_lea.vmem [#allocation3], %s1064_s24 }
  0x1b   : > { %v299_v18 = vld [vmem:[#allocation2] sm:$0x1]  ;;  %v289_v59 = vld [vmem:[%s1444_s3 + $0x8] sm:$0xff]  ;;  %v291_v61 = vld [vmem:[%s1444_s3 + $0x18] sm:$0xff]  ;;  %s1001_s9 = sshll.u32 %s274_s30, 4  ;;  %s1002_s9 = int_to_ptr.vmem [resolvable:$true] %s1001_s9 }
  0x1c   : > { %1067 = vmatprep.subr.msk.mxu0 %vm331_vm0, %v319_v9  ;;  %1072 = vmatprep.subr.msk.mxu1 %vm331_vm0, %v320_v10  ;;  %v288_v58 = vld [vmem:[%s1444_s3] sm:$0xff]  ;;  %s1153_s17 = scalar_lea.vmem %s1002_s9, 64  ;;  %p1160_p0 = scmp.lt.s32.totalorder %s1002_s9, %s1158_s19 }
  0x1d   : > { %309 = vperm.xlu0 %1141, %v286_v5   ;;  %540 = vperm.xlu1 %1142, %v297_v6   ;;  %v292_v62 = vld [vmem:[%s1444_s3 + $0x20] sm:$0xf]  ;;  %p1154_p11 = scmp.ne.s32.totalorder %s1002_s9, %s1153_s17  ;;  %p1161_p1 = scmp.lt.s32.totalorder %s1159_s6, %s1153_s17 }
  0x1e   : > { %1068 = vmatpush1.msk.msra.mxu0 %vm331_vm0, %v300_v7  ;;  %1073 = vmatpush1.msk.msra.mxu1 %vm331_vm0, %v301_v8 }
  0x1f   : > { %1069 = vmatmul.mubr.msk.f32.vlgmr.msra.gmra.mxu0 %vm321_vm1, %v282_v11  ;;  %1074 = vmatmul.mubr.msk.f32.vlgmr.msra.gmra.mxu1 %vm321_vm1, %v282_v11  ;;  %p1155_p12 = pnand %p1154_p11, %p1300_p5  ;;  %p1162_p2 = por %p1161_p1, %p1160_p0 }
  0x20   : > { %410 = vmatprep.mubr.f32.mxu0 %v1215_v1  ;;  %493 = vmatprep.mubr.f32.mxu1 %v1215_v1 }
  0x21   : > { %535 = vperm.xlu0 %1141, %v296_v12   ;;  %530 = vperm.xlu1 %1142, %v295_v13   ;;  %p1156_p13 = pneg %p1155_p12 }
  0x23   : > { %1070 = vmatmul.mubr.msk.f32.gmra.mxu0 %vm321_vm1, %v283_v14  ;;  %1075 = vmatmul.mubr.msk.f32.gmra.mxu1 %vm321_vm1, %v283_v14  ;;  %p1163_p3 = pnand %p1162_p2, %p1156_p13 }
  0x24   : > { %416 = vmatprep.mubr.f32.mxu0 %v1215_v1  ;;  %499 = vmatprep.mubr.f32.mxu1 %v1215_v1 }
  0x25   : > { %525 = vperm.xlu0 %1141, %v294_v15   ;;  %520 = vperm.xlu1 %1142, %v293_v16  }
  0x27   : > { %1071 = vmatmul.mubr.msk.f32.gmra.mxu0 %vm321_vm1, %v284_v17  ;;  %1076 = vmatmul.mubr.msk.f32.gmra.mxu1 %vm321_vm1, %v284_v17 }
  0x28   : > { %623 = vmatprep.mubr.f32.mxu0 %v1215_v1  ;;  %718 = vmatprep.mubr.f32.mxu1 %v1215_v1 }
  0x29   : > { %771 = vperm.xlu0 %1141, %v299_v18  }
  0x94   : > { %v315_v23 = vpop.permute.xlu0 %314  ;;  %v305_v35 = vpop.permute.xlu1 %304 }
  0x98   : > { %v310_v30 = vpop.permute.xlu0 %309  ;;  %v541_v12 = vpop.permute.xlu1 %540 }
  0x9c   : > { %v536_v17 = vpop.permute.xlu0 %535 }
  0xdf   : > { %v406_v19 = vpop.f32.mrf.mxu0  ;;  %v489_v20 = vpop.f32.mrf.mxu1 }
  0xe0   : > { %v407_v46 = vadd.f32 %v406_v19, %v305_v35  ;;  %v490_v47 = vadd.f32 %v489_v20, %v305_v35  ;;  %v531_v19 = vpop.permute.xlu1 %530 }
  0xe1   : > { %v408_v21 = vpop.f32.mrf.mxu0  ;;  %v491_v22 = vpop.f32.mrf.mxu1 }
  0xe2   : > { %v409_v42 = vadd.f32 %v408_v21, %v305_v35  ;;  %v492_v43 = vadd.f32 %v491_v22, %v305_v35  ;;  %v506_v56 = vmax.f32 %v407_v46, 0.0  ;;  %v508_v57 = vmax.f32 %v490_v47, 0.0 }
  0xe3   : > { %v412_v24 = vpop.f32.mrf.mxu0  ;;  %v495_v25 = vpop.f32.mrf.mxu1 }
  0xe4   : > { %v413_v40 = vadd.f32 %v412_v24, %v310_v30  ;;  %v496_v41 = vadd.f32 %v495_v25, %v310_v30  ;;  %v507_v54 = vmax.f32 %v409_v42, 0.0  ;;  %v509_v55 = vmax.f32 %v492_v43, 0.0  ;;  %v521_v43 = vpop.permute.xlu1 %520 }
  0xe5   : > { %v414_v26 = vpop.f32.mrf.mxu0  ;;  %v497_v27 = vpop.f32.mrf.mxu1 }
  0xe6   : > { %v415_v36 = vadd.f32 %v414_v26, %v310_v30  ;;  %v498_v37 = vadd.f32 %v497_v27, %v310_v30  ;;  %v510_v52 = vmax.f32 %v413_v40, 0.0  ;;  %v512_v53 = vmax.f32 %v496_v41, 0.0 }
  0xe7   : > { %v418_v28 = vpop.f32.mrf.mxu0  ;;  %v501_v29 = vpop.f32.mrf.mxu1 }
  0xe8   : > { %v419_v31 = vadd.f32 %v418_v28, %v315_v23  ;;  %v502_v32 = vadd.f32 %v501_v29, %v315_v23  ;;  %v511_v50 = vmax.f32 %v415_v36, 0.0  ;;  %v513_v51 = vmax.f32 %v498_v37, 0.0 }
  0xe9   : > { %v420_v33 = vpop.f32.mrf.mxu0  ;;  %v503_v34 = vpop.f32.mrf.mxu1 }
  0xea   : > { %v421_v38 = vadd.f32 %v420_v33, %v315_v23  ;;  %v504_v39 = vadd.f32 %v503_v34, %v315_v23  ;;  %v514_v48 = vmax.f32 %v419_v31, 0.0  ;;  %v516_v49 = vmax.f32 %v502_v32, 0.0  ;;  %v526_v34 = vpop.permute.xlu0 %525 }
  0xec   : > { %v515_v44 = vmax.f32 %v421_v38, 0.0  ;;  %v517_v45 = vmax.f32 %v504_v39, 0.0 }
  0xee   : > { %585 = vmatprep.subr.mxu0 %v515_v44  ;;  %680 = vmatprep.subr.mxu1 %v517_v45 }
  0xef   : > { %586 = vmatpush1.msra.mxu0 %v514_v48  ;;  %681 = vmatpush1.msra.mxu1 %v516_v49 }
  0xf0   : > { %587 = vmatprep.subr.mxu0 %v511_v50  ;;  %682 = vmatprep.subr.mxu1 %v513_v51 }
  0xf1   : > { %588 = vmatpush1.msra.mxu0 %v510_v52  ;;  %683 = vmatpush1.msra.mxu1 %v512_v53 }
  0xf2   : > { %589 = vmatprep.subr.mxu0 %v507_v54  ;;  %684 = vmatprep.subr.mxu1 %v509_v55 }
  0xf3   : > { %590 = vmatpush1.msra.mxu0 %v506_v56  ;;  %685 = vmatpush1.msra.mxu1 %v508_v57 }
  0xf4   : > { %1077 = vmatmul.mubr.msk.f32.vlgmr.msra.gmra.mxu0 %vm543_vm2, %v288_v58  ;;  %1082 = vmatmul.mubr.msk.f32.vlgmr.msra.gmra.mxu1 %vm543_vm2, %v288_v58 }
  0xf5   : > { %629 = vmatprep.mubr.f32.mxu0 %v1215_v1  ;;  %724 = vmatprep.mubr.f32.mxu1 %v1215_v1 }
  0xf8   : > { %1078 = vmatmul.mubr.msk.f32.gmra.mxu0 %vm543_vm2, %v289_v59  ;;  %1083 = vmatmul.mubr.msk.f32.gmra.mxu1 %vm543_vm2, %v289_v59 }
  0xf9   : > { %635 = vmatprep.mubr.f32.mxu0 %v1215_v1  ;;  %730 = vmatprep.mubr.f32.mxu1 %v1215_v1 }
  0xfc   : > { %1079 = vmatmul.mubr.msk.f32.gmra.mxu0 %vm543_vm2, %v290_v60  ;;  %1084 = vmatmul.mubr.msk.f32.gmra.mxu1 %vm543_vm2, %v290_v60 }
  0xfd   : > { %641 = vmatprep.mubr.f32.mxu0 %v1215_v1  ;;  %736 = vmatprep.mubr.f32.mxu1 %v1215_v1 }
 0x100   : > { %1080 = vmatmul.mubr.msk.f32.gmra.mxu0 %vm543_vm2, %v291_v61  ;;  %1085 = vmatmul.mubr.msk.f32.gmra.mxu1 %vm543_vm2, %v291_v61 }
 0x101   : > { %647 = vmatprep.mubr.f32.mxu0 %v1215_v1  ;;  %742 = vmatprep.mubr.f32.mxu1 %v1215_v1 }
 0x104   : > { %1081 = vmatmul.mubr.msk.f32.gmra.mxu0 %vm543_vm2, %v292_v62  ;;  %1086 = vmatmul.mubr.msk.f32.gmra.mxu1 %vm543_vm2, %v292_v62 }
 0x105   : > { %858 = vmatprep.mubr.f32.mxu0 %v1215_v1  ;;  %929 = vmatprep.mubr.f32.mxu1 %v1215_v1 }
 0x1b4   : > { %v625_v63 = vpop.f32.mrf.mxu0  ;;  %v720_v0 = vpop.f32.mrf.mxu1 }
 0x1b5   : > { %v626_v52 = vadd.f32 %v625_v63, %v521_v43  ;;  %v721_v53 = vadd.f32 %v720_v0, %v521_v43  ;;  %v298_v63 = vld [vmem:[%s1446_s5] sm:$0x1]  ;;  %v774_v0 = vlaneseq }
 0x1b6   : > { %v627_v2 = vpop.f32.mrf.mxu0  ;;  %v722_v3 = vpop.f32.mrf.mxu1 }
 0x1b7   : > { %v628_v48 = vadd.f32 %v627_v2, %v521_v43  ;;  %v723_v49 = vadd.f32 %v722_v3, %v521_v43  ;;  %v749_v62 = vmax.f32 %v626_v52, 0.0  ;;  %v751_v2 = vmax.f32 %v721_v53, 0.0 }
 0x1b8   : > { %v631_v4 = vpop.f32.mrf.mxu0  ;;  %v726_v5 = vpop.f32.mrf.mxu1  ;;  %v775_v3 = vshrl.u32 %v774_v0, 7  ;;  %vm983_vm4 = vcmp.lt.s32.totalorder %v774_v0, 512 }
 0x1b9   : > { %v632_v44 = vadd.f32 %v631_v4, %v526_v34  ;;  %v727_v45 = vadd.f32 %v726_v5, %v526_v34  ;;  %v750_v60 = vmax.f32 %v628_v48, 0.0  ;;  %v752_v61 = vmax.f32 %v723_v49, 0.0  ;;  %v772_v5 = vpop.permute.xlu0 %771 }
 0x1ba   : > { %v633_v6 = vpop.f32.mrf.mxu0  ;;  %v728_v7 = vpop.f32.mrf.mxu1  ;;  %v776_v4 = vsub.s32 0, %v775_v3 }
 0x1bb   : > { %v634_v39 = vadd.f32 %v633_v6, %v526_v34  ;;  %v729_v40 = vadd.f32 %v728_v7, %v526_v34  ;;  %v753_v58 = vmax.f32 %v632_v44, 0.0  ;;  %v755_v59 = vmax.f32 %v727_v45, 0.0 }
 0x1bc   : > { %v637_v8 = vpop.f32.mrf.mxu0  ;;  %v732_v9 = vpop.f32.mrf.mxu1  ;;  %v777_v6 = vrot.slane %v772_v5, %v776_v4 }
 0x1bd   : > { %v638_v35 = vadd.f32 %v637_v8, %v531_v19  ;;  %v733_v36 = vadd.f32 %v732_v9, %v531_v19  ;;  %v754_v56 = vmax.f32 %v634_v39, 0.0  ;;  %v756_v57 = vmax.f32 %v729_v40, 0.0 }
 0x1be   : > { %v639_v10 = vpop.f32.mrf.mxu0  ;;  %v734_v11 = vpop.f32.mrf.mxu1 }
 0x1bf   : > { %v640_v30 = vadd.f32 %v639_v10, %v531_v19  ;;  %v735_v31 = vadd.f32 %v734_v11, %v531_v19  ;;  %v757_v54 = vmax.f32 %v638_v35, 0.0  ;;  %v759_v55 = vmax.f32 %v733_v36, 0.0 }
 0x1c0   : > { %v643_v13 = vpop.f32.mrf.mxu0  ;;  %v738_v14 = vpop.f32.mrf.mxu1 }
 0x1c1   : > { %v644_v28 = vadd.f32 %v643_v13, %v536_v17  ;;  %v739_v29 = vadd.f32 %v738_v14, %v536_v17  ;;  %v758_v50 = vmax.f32 %v640_v30, 0.0  ;;  %v760_v51 = vmax.f32 %v735_v31, 0.0 }
 0x1c2   : > { %v645_v15 = vpop.f32.mrf.mxu0  ;;  %v740_v16 = vpop.f32.mrf.mxu1 }
 0x1c3   : > { %v646_v24 = vadd.f32 %v645_v15, %v536_v17  ;;  %v741_v25 = vadd.f32 %v740_v16, %v536_v17  ;;  %v761_v46 = vmax.f32 %v644_v28, 0.0  ;;  %v763_v47 = vmax.f32 %v739_v29, 0.0 }
 0x1c4   : > { %v649_v18 = vpop.f32.mrf.mxu0  ;;  %v744_v1 = vpop.f32.mrf.mxu1 }
 0x1c5   : > { %v650_v20 = vadd.f32 %v649_v18, %v541_v12  ;;  %v745_v21 = vadd.f32 %v744_v1, %v541_v12  ;;  %v762_v41 = vmax.f32 %v646_v24, 0.0  ;;  %v764_v42 = vmax.f32 %v741_v25, 0.0 }
 0x1c6   : > { %v651_v22 = vpop.f32.mrf.mxu0  ;;  %v746_v23 = vpop.f32.mrf.mxu1  ;;  %v1217_v1 = vmov 1966171168  }
 0x1c7   : > { %v652_v26 = vadd.f32 %v651_v22, %v541_v12  ;;  %v747_v27 = vadd.f32 %v746_v23, %v541_v12  ;;  %v765_v37 = vmax.f32 %v650_v20, 0.0  ;;  %v767_v38 = vmax.f32 %v745_v21, 0.0 }
 0x1c8   : > { %v959_v19 = vunpack.c.l.s4 %v1217_v1 }
 0x1c9   : > { %v766_v32 = vmax.f32 %v652_v26, 0.0  ;;  %v768_v33 = vmax.f32 %v747_v27, 0.0 }
 0x1ca   : > { %v960_v22 = vunpack.c.0.s8 %v959_v19 }
 0x1cb   : > { %1087 = vmatprep.subr.msk.mxu0 %vm331_vm0, %v766_v32  ;;  %1090 = vmatprep.subr.msk.mxu1 %vm331_vm0, %v768_v33 }
 0x1cc   : > { %1088 = vmatpush1.msk.msra.mxu0 %vm331_vm0, %v765_v37  ;;  %1091 = vmatpush1.msk.msra.mxu1 %vm331_vm0, %v767_v38  ;;  %v963_v29 = vsub.s32 %v960_v22, %v775_v3 }
 0x1cd   : > { %818 = vmatprep.subr.mxu0 %v762_v41  ;;  %889 = vmatprep.subr.mxu1 %v764_v42 }
 0x1ce   : > { %819 = vmatpush1.msra.mxu0 %v761_v46  ;;  %890 = vmatpush1.msra.mxu1 %v763_v47 }
 0x1cf   : > { %820 = vmatprep.subr.mxu0 %v758_v50  ;;  %891 = vmatprep.subr.mxu1 %v760_v51 }
 0x1d0   : > { %821 = vmatpush1.msra.mxu0 %v757_v54  ;;  %892 = vmatpush1.msra.mxu1 %v759_v55 }
 0x1d1   : > { %822 = vmatprep.subr.mxu0 %v754_v56  ;;  %893 = vmatprep.subr.mxu1 %v756_v57 }
 0x1d2   : > { %823 = vmatpush1.msra.mxu0 %v753_v58  ;;  %894 = vmatpush1.msra.mxu1 %v755_v59 }
 0x1d3   : > { %824 = vmatprep.subr.mxu0 %v750_v60  ;;  %895 = vmatprep.subr.mxu1 %v752_v61 }
 0x1d4   : > { %825 = vmatpush1.msra.mxu0 %v749_v62  ;;  %896 = vmatpush1.msra.mxu1 %v751_v2 }
 0x1d5   : > { %1089 = vmatmul.mubr.msk.f32.vlgmr.msra.gmra.mxu0 %vm778_vm3, %v298_v63  ;;  %1092 = vmatmul.mubr.msk.f32.vlgmr.msra.gmra.mxu1 %vm778_vm3, %v298_v63 }
 0x295   : > { %v860_v7 = vpop.f32.mrf.mxu0  ;;  %v931_v8 = vpop.f32.mrf.mxu1 }
 0x296   : > { %v861_v9 = vadd.f32 %v860_v7, %v777_v6  ;;  %v932_v10 = vadd.f32 %v931_v8, %v777_v6 }
 0x297   : > { %v862_v11 = vpop.f32.mrf.mxu0  ;;  %v933_v12 = vpop.f32.mrf.mxu1 }
 0x298   : > { %v936_v13 = vmul.f32 0.5, %v861_v9  ;;  %v938_v14 = vmul.f32 0.5, %v932_v10  ;;  %v863_v15 = vadd.f32 %v862_v11, %v777_v6  ;;  %v934_v16 = vadd.f32 %v933_v12, %v777_v6 }
 0x29a   : > { %1145 = vtanh.f32 %v936_v13  ;;  %v937_v17 = vmul.f32 0.5, %v863_v15  ;;  %v939_v18 = vmul.f32 0.5, %v934_v16 }
 0x29b   : > { %1147 = vtanh.f32 %v938_v14 }
 0x29c   : > { %1149 = vtanh.f32 %v937_v17 }
 0x29d   : > { %1151 = vtanh.f32 %v939_v18 }
 0x2a7   : > { %v1146_v20 = vpop.eup %1145 }
 0x2a8   : > { %v1148_v21 = vpop.eup %1147  ;;  %v944_v23 = vmul.f32 0.5, %v1146_v20 }
 0x2a9   : > { %v1150_v24 = vpop.eup %1149  ;;  %v946_v25 = vmul.f32 0.5, %v1148_v21 }
 0x2aa   : > { %v1152_v26 = vpop.eup %1151  ;;  %v945_v27 = vmul.f32 0.5, %v1150_v24  ;;  %v948_v30 = vadd.f32 0.5, %v944_v23 }
 0x2ab   : > { %v947_v28 = vmul.f32 0.5, %v1152_v26  ;;  %v950_v32 = vadd.f32 0.5, %v946_v25 }
 0x2ac   : > { %v949_v31 = vadd.f32 0.5, %v945_v27 }
 0x2ad   : > { %v951_v33 = vadd.f32 0.5, %v947_v28 }
 0x2ae   : > { %v956_v34 = vcombine.low %v948_v30, %v949_v31 }
 0x2af   : > { %v957_v35 = vcombine.low %v950_v32, %v951_v33 }
 0x2b0   : > { %v964_v36 = vrot.slane %v956_v34, %v963_v29 }
 0x2b1   : > { %v971_v37 = vrot.slane %v957_v35, %v963_v29 }
 0x2b3   : > { %v972_v38 = vcombine.low %v964_v36, %v971_v37 }
 0x2b5   : > { %v979_v39 = vrot.slane %v972_v38, %v963_v29 }
 0x2b7   : > { %985 = vst.msk [vmem:[%s274_s30] sm:$0xf] %vm983_vm4, %v979_v39 }
 0x2b8   : > { %1166 = shalt.err (!%p1163_p3)
}
 0x2b9   : > { %s1167_s20 = scalar_lea.hbm %s999_s15, 64  ;;  %s1171_s23 = scalar_lea.hbm %s1448_s7, 128 }
 0x2ba   : > { %p1168_p4 = scmp.ne.s32.totalorder %s999_s15, %s1167_s20  ;;  %p1172_p9 = scmp.lt.s32.totalorder %s999_s15, %s1448_s7 }
 0x2bb   : > { %p1173_p10 = scmp.lt.s32.totalorder %s1171_s23, %s1167_s20 }
 0x2bc   : > { %p1169_p7 = pnand %p1168_p4, %p1300_p5 }
 0x2bd   : > { %p1174_p11 = por %p1173_p10, %p1172_p9 }
 0x2be   : > { %p1170_p8 = pneg %p1169_p7 }
 0x2c0   : > { %p1175_p12 = pnand %p1174_p11, %p1170_p8 }
 0x2c2   : > { %1178 = shalt.err (!%p1175_p12)
}
 0x2c3   : > { %1099 = dma.vmem_to_hbm [thread:$0]  (%p1300_p5), %s1002_s9, 64, %s999_s15, %s987_s16  }
 0x2c4 PF: > { %p1105_p13 = scmp.ge.s32.totalorder %s1213_s29, 2  ;;  %s1013_s30 = sand.u32 1, %s1201_s26  }
 0x2c5   : > { %s1014_s10 = scalar_lea.sflag [#allocation4], %s1013_s30 }
 0x2c6   : > { %p1102_p0 = pnand %p1105_p13, %p1304_p6 }
 0x2c8   : > { %p1103_p1 = pneg %p1102_p0 }
 0x2ca   : > { %1196 = dma.done.wait (%p1103_p1), %s1014_s10, 64  }
 0x2cb   : > { %1198 = vsyncadd (%p1103_p1), %s1014_s10, 4294967232  ;;  %p19_p2 = scmp.ge.s32.totalorder %s1287_s8, 4   ;;  %s1451_s26 = smov %s1205_s27 }
 0x2cc   : > { %s1452_s27 = smov %s1209_s28  ;;  %s1453_s28 = smov %s1298_s11 }
 0x2cd   : > { %s1454_s29 = smov %s1287_s8  ;;  %21 = sbr.rel (!%p19_p2) target bundleno = 6 (0x6), region = 83 }
 0x2d2   :  { %1019 = vsyncpa [#allocation4], 1 }
 0x2d3   :  { %1021 = vsyncpa [#allocation4 + $0x1], 1 }

</bundles_post_ra>
